<compile_context>
chip_gen: v5e
topology: v5e:2x2
jax: 0.10.0
libtpu: 0.0.40
codegen_flags: <defaults>
</compile_context>

<pallas_src>
import functools
import math

import jax
import jax.numpy as jnp
from jax import lax
from jax.experimental import pallas as pl
from jax.experimental.pallas import tpu as pltpu


# ----------------------------------------------------------------------------
# Kernel 1: fused QKV projection + XPOS (half-rotation layout) -> bf16 Q, K, V
# ----------------------------------------------------------------------------
def _proj_xpos_kernel(x_ref, w_ref, cq_ref, sq_ref, ck_ref, sk_ref,
                      q_ref, k_ref, v_ref, *, head_dim):
    x = x_ref[0]                                                          # (TR, H)
    # Single fused projection: W = [W_Q | W_K | W_V]  (one MXU pass, wider N).
    xw = jnp.dot(x, w_ref[...], preferred_element_type=jnp.float32)      # (TR, 2Dh+Dv)
    q = xw[:, :head_dim]
    k = xw[:, head_dim:2 * head_dim]
    v = xw[:, 2 * head_dim:]

    half = head_dim // 2
    # XPOS in [first-half | second-half] layout: one XLU roll per tensor,
    # the minus sign of rotate_every_two is folded into the pre-permuted sin tables.
    q = q * cq_ref[...] + pltpu.roll(q, shift=half, axis=1) * sq_ref[...]
    k = k * ck_ref[...] + pltpu.roll(k, shift=half, axis=1) * sk_ref[...]

    q_ref[0] = q.astype(q_ref.dtype)
    k_ref[0] = k.astype(k_ref.dtype)
    v_ref[0] = v.astype(v_ref.dtype)


# ----------------------------------------------------------------------------
# Kernel 2: flash-style decayed retention, grid = (B, nq, nk), nk innermost
# ----------------------------------------------------------------------------
def _retention_kernel(q_ref, k_ref, v_ref, o_ref, acc_ref, *, log_gamma, tq, tk):
    qi = pl.program_id(1)
    ki = pl.program_id(2)

    @pl.when(ki == 0)
    def _init():
        acc_ref[...] = jnp.zeros_like(acc_ref)

    # Causality: the decay matrix zeroes every (n, m) with n < m, so a key tile
    # whose lowest index exceeds the query tile's highest index is skipped
    # (its DMA is also elided by the clamped index_map in the wrapper).
    @pl.when(ki * tk < (qi + 1) * tq)
    def _compute():
        q = q_ref[0]                                     # (TQ, Dh) bf16
        k = k_ref[0]                                     # (TK, Dh) bf16
        v = v_ref[0]                                     # (TK, Dv) bf16
        # Q K^T without materializing a transpose: contract dim 1 of both operands.
        s = lax.dot_general(q, k, (((1,), (1,)), ((), ())),
                            preferred_element_type=jnp.float32)          # (TQ, TK)
        # Decay tile generated in-kernel (EUP exp rides under the MXU).
        n = lax.broadcasted_iota(jnp.int32, (tq, tk), 0) + qi * tq
        m = lax.broadcasted_iota(jnp.int32, (tq, tk), 1) + ki * tk
        diff = n - m
        expo = jnp.maximum(diff, 0).astype(jnp.float32)                  # mask BEFORE exp
        d = jnp.where(diff >= 0, jnp.exp(jnp.float32(log_gamma) * expo), 0.0)
        p = (s * d).astype(v.dtype)                                      # bf16 scores
        acc_ref[...] += jnp.dot(p, v, preferred_element_type=jnp.float32)

    @pl.when(ki == pl.num_programs(2) - 1)
    def _write():
        o_ref[0] = acc_ref[...].astype(o_ref.dtype)


# ----------------------------------------------------------------------------
# Plain-JAX glue: XPOS tables in the permuted [even | odd] half-rotation layout
# ----------------------------------------------------------------------------
def _xpos_tables_halfrot(seq_len, head_dim, scale_base=512.0):
    half = head_dim // 2
    scale = (jnp.arange(0, head_dim, 2, dtype=jnp.float32) + 0.4 * head_dim) / (1.4 * head_dim)
    pos = jnp.arange(seq_len, dtype=jnp.float32)
    scale_pow = scale[None, :] ** (pos[:, None] / scale_base)            # (S, Dh/2)

    inv_freq = 1.0 / (10000.0 ** (jnp.arange(half, dtype=jnp.float32) / half))
    sinusoid = pos[:, None] * inv_freq[None, :]                          # (S, Dh/2)
    sin, cos = jnp.sin(sinusoid), jnp.cos(sinusoid)

    # [even | odd] column layout; minus sign of rotate_every_two folded into sin.
    cos_q = jnp.concatenate([cos * scale_pow, cos * scale_pow], axis=1)
    sin_q = jnp.concatenate([-sin * scale_pow, sin * scale_pow], axis=1)
    inv_sp = 1.0 / scale_pow
    cos_k = jnp.concatenate([cos * inv_sp, cos * inv_sp], axis=1)
    sin_k = jnp.concatenate([-sin * inv_sp, sin * inv_sp], axis=1)
    return cos_q, sin_q, cos_k, sin_k


# ----------------------------------------------------------------------------
# Wrapper
# ----------------------------------------------------------------------------
def simple_retention(x, w_q, w_k, w_v, gamma, scale_base=512.0,
                     row_tile=256, q_tile=256, k_tile=256):
    B, S, H = x.shape
    Dh = w_q.shape[1]
    Dv = w_v.shape[1]
    assert Dh % 2 == 0, "XPOS requires an even head dimension"

    # Tile sizes: full extent for small S, otherwise 256-wide sequence tiles.
    tr = S if S <= row_tile else row_tile
    tq = S if S <= q_tile else q_tile
    tk = S if S <= k_tile else k_tile
    assert S % tr == 0 and S % tq == 0 and S % tk == 0, "seq_len must divide the tiles"

    # Permute Q/K columns to [even | odd] layout (Q.K^T is invariant to a shared
    # permutation of the head dim) and fuse the three projection weights.
    perm = jnp.concatenate([jnp.arange(0, Dh, 2), jnp.arange(1, Dh, 2)])
    w_qkv = jnp.concatenate([w_q[:, perm], w_k[:, perm], w_v], axis=1).astype(jnp.float32)
    Dqkv = 2 * Dh + Dv

    cos_q, sin_q, cos_k, sin_k = _xpos_tables_halfrot(S, Dh, scale_base)

    vmem_limit = 32 * 1024 * 1024  # explicit, safe on v5e/v6e/v7x for these tiles

    # --- Kernel 1: fused projection + XPOS -> bf16 Q, K, V -------------------
    q, k, v = pl.pallas_call(
        functools.partial(_proj_xpos_kernel, head_dim=Dh),
        out_shape=(
            jax.ShapeDtypeStruct((B, S, Dh), jnp.bfloat16),
            jax.ShapeDtypeStruct((B, S, Dh), jnp.bfloat16),
            jax.ShapeDtypeStruct((B, S, Dv), jnp.bfloat16),
        ),
        grid_spec=pltpu.PrefetchScalarGridSpec(
            num_scalar_prefetch=0,
            grid=(B, S // tr),
            in_specs=[
                pl.BlockSpec((1, tr, H), lambda b, r: (b, r, 0)),    # X row tile
                pl.BlockSpec((H, Dqkv), lambda b, r: (0, 0)),        # fused W_QKV (resident)
                pl.BlockSpec((tr, Dh), lambda b, r: (r, 0)),         # cos_q
                pl.BlockSpec((tr, Dh), lambda b, r: (r, 0)),         # sin_q (signed)
                pl.BlockSpec((tr, Dh), lambda b, r: (r, 0)),         # cos_k
                pl.BlockSpec((tr, Dh), lambda b, r: (r, 0)),         # sin_k (signed)
            ],
            out_specs=[
                pl.BlockSpec((1, tr, Dh), lambda b, r: (b, r, 0)),
                pl.BlockSpec((1, tr, Dh), lambda b, r: (b, r, 0)),
                pl.BlockSpec((1, tr, Dv), lambda b, r: (b, r, 0)),
            ],
        ),
        compiler_params=pltpu.CompilerParams(
            dimension_semantics=("parallel", "parallel"),
            vmem_limit_bytes=vmem_limit,
        ),
    )(x.astype(jnp.float32), w_qkv, cos_q, sin_q, cos_k, sin_k)

    # --- Kernel 2: tiled decayed attention -----------------------------------
    # gamma is a static module hyperparameter, so log(gamma) is baked in as a
    # compile-time constant (cheaper than shipping even an SMEM scalar).
    log_gamma = math.log(float(gamma))

    # K/V index maps clamped to the last causally-needed kv tile: for the
    # skipped (non-causal) grid steps the block index repeats, so Pallas skips
    # the DMA entirely (no wasted HBM bandwidth on tiles that are never read).
    def _kv_map(b, i, j):
        last_needed = ((i + 1) * tq - 1) // tk
        return (b, jnp.minimum(j, last_needed), 0)

    out = pl.pallas_call(
        functools.partial(_retention_kernel, log_gamma=log_gamma, tq=tq, tk=tk),
        out_shape=jax.ShapeDtypeStruct((B, S, Dv), jnp.float32),
        grid_spec=pltpu.PrefetchScalarGridSpec(
            num_scalar_prefetch=0,
            grid=(B, S // tq, S // tk),
            in_specs=[
                pl.BlockSpec((1, tq, Dh), lambda b, i, j: (b, i, 0)),   # Q tile
                pl.BlockSpec((1, tk, Dh), _kv_map),                     # K tile
                pl.BlockSpec((1, tk, Dv), _kv_map),                     # V tile
            ],
            out_specs=pl.BlockSpec((1, tq, Dv), lambda b, i, j: (b, i, 0)),
            scratch_shapes=[pltpu.VMEM((tq, Dv), jnp.float32)],
        ),
        compiler_params=pltpu.CompilerParams(
            dimension_semantics=("parallel", "parallel", "arbitrary"),
            vmem_limit_bytes=vmem_limit,
        ),
    )(q, k, v)
    return out


# Pure-JAX reference (same math as the PyTorch forward) for a sanity check.
# TODO(synk): XPOS source is not part of the given spec; this uses the common
# min_pos=0 RetNet-repo convention, consistently in both kernel and reference.
def simple_retention_ref(x, w_q, w_k, w_v, gamma, scale_base=512.0):
    S = x.shape[1]
    Dh = w_q.shape[1]
    half = Dh // 2
    scale = (jnp.arange(0, Dh, 2, dtype=jnp.float32) + 0.4 * Dh) / (1.4 * Dh)
    pos = jnp.arange(S, dtype=jnp.float32)
    scale_pow = scale[None, :] ** (pos[:, None] / scale_base)
    inv_freq = 1.0 / (10000.0 ** (jnp.arange(half, dtype=jnp.float32) / half))
    sinusoid = pos[:, None] * inv_freq[None, :]
    sin, cos = jnp.sin(sinusoid), jnp.cos(sinusoid)

    def dup(m):  # duplicate_interleave
        return jnp.repeat(m, 2, axis=1)

    cos_q, sin_q = dup(cos * scale_pow), dup(sin * scale_pow)
    cos_k, sin_k = dup(cos / scale_pow), dup(sin / scale_pow)

    n = jnp.arange(S)[:, None]
    m = jnp.arange(S)[None, :]
    D = jnp.where(n >= m,
                  jnp.float32(gamma) ** jnp.maximum(n - m, 0).astype(jnp.float32),
                  0.0)

    q = x @ w_q
    k = x @ w_k
    v = x @ w_v

    def rot(t):  # rotate_every_two
        t1 = t[..., ::2]
        t2 = t[..., 1::2]
        return jnp.stack([-t2, t1], axis=-1).reshape(t.shape)

    q = q * cos_q + rot(q) * sin_q
    k = k * cos_k + rot(k) * sin_k
    ret = jnp.einsum('bqd,bkd->bqk', q, k) * D[None]
    return jnp.einsum('bqk,bkd->bqd', ret, v)


if __name__ == "__main__":
    # Small, deterministic configuration (matches the module defaults).
    B, S, H = 2, 8, 32
    head_size = H                # default head_size = hidden_size
    double_v_dim = False
    v_dim = head_size * 2 if double_v_dim else head_size
    gamma = 0.9

    key = jax.random.PRNGKey(0)
    kx, kq, kk, kv = jax.random.split(key, 4)
    x = jax.random.normal(kx, (B, S, H), dtype=jnp.float32)
    w_q = jax.random.normal(kq, (H, head_size), dtype=jnp.float32) / H
    w_k = jax.random.normal(kk, (H, head_size), dtype=jnp.float32) / H
    w_v = jax.random.normal(kv, (H, v_dim), dtype=jnp.float32) / H

    out = simple_retention(x, w_q, w_k, w_v, gamma)
    out = jax.block_until_ready(out)

    ref = simple_retention_ref(x, w_q, w_k, w_v, gamma)
    assert out.shape == (B, S, v_dim)
    # bf16 MXU inputs (f32 accumulation) vs. an f32 reference -> relaxed tolerance.
    assert jnp.allclose(out, ref, atol=2e-2, rtol=2e-2), "mismatch vs. reference"
    print("KERNEL_OK")
</pallas_src>

<mosaic_0001>
module attributes {stable_mosaic.version = 11 : i64} {
  func.func @_proj_xpos_kernel(%arg0: i32, %arg1: i32, %arg2: memref<1x8x32xf32, #tpu.memory_space<vmem>>, %arg3: memref<32x96xf32, #tpu.memory_space<vmem>>, %arg4: memref<8x32xf32, #tpu.memory_space<vmem>>, %arg5: memref<8x32xf32, #tpu.memory_space<vmem>>, %arg6: memref<8x32xf32, #tpu.memory_space<vmem>>, %arg7: memref<8x32xf32, #tpu.memory_space<vmem>>, %arg8: memref<1x8x32xbf16, #tpu.memory_space<vmem>>, %arg9: memref<1x8x32xbf16, #tpu.memory_space<vmem>>, %arg10: memref<1x8x32xbf16, #tpu.memory_space<vmem>>) attributes {dimension_semantics = [#tpu.dimension_semantics<parallel>, #tpu.dimension_semantics<parallel>], iteration_bounds = array<i64: 2, 1>, scalar_prefetch = 0 : i64, scratch_operands = 0 : i64, tpu.core_type = #tpu.core_type<tc>, window_params = [{transform_indices = @transform_0, window_bounds = array<i64: 1, 8, 32>}, {pipeline_mode = #tpu.pipeline_mode<synchronous>, transform_indices = @transform_1, window_bounds = array<i64: 32, 96>}, {transform_indices = @transform_2, window_bounds = array<i64: 8, 32>}, {transform_indices = @transform_3, window_bounds = array<i64: 8, 32>}, {transform_indices = @transform_4, window_bounds = array<i64: 8, 32>}, {transform_indices = @transform_5, window_bounds = array<i64: 8, 32>}, {transform_indices = @transform_6, window_bounds = array<i64: 1, 8, 32>}, {transform_indices = @transform_7, window_bounds = array<i64: 1, 8, 32>}, {transform_indices = @transform_8, window_bounds = array<i64: 1, 8, 32>}]} {
    %c0 = arith.constant 0 : index
    %c0_0 = arith.constant 0 : index
    %c0_1 = arith.constant 0 : index
    %0 = vector.load %arg2[%c0, %c0_0, %c0_1] : memref<1x8x32xf32, #tpu.memory_space<vmem>>, vector<1x8x32xf32>
    %1 = vector.shape_cast %0 : vector<1x8x32xf32> to vector<8x32xf32>
    %c0_2 = arith.constant 0 : index
    %c0_3 = arith.constant 0 : index
    %2 = vector.load %arg3[%c0_2, %c0_3] : memref<32x96xf32, #tpu.memory_space<vmem>>, vector<32x96xf32>
    %cst = arith.constant dense<0.000000e+00> : vector<8x96xf32>
    %3 = tpu.matmul %1, %2, %cst {dimension_numbers = #tpu.dot_dimension_numbers<[1], [0], [0], [1], [0, 0, 1, 1], [], []>} : vector<8x32xf32>, vector<32x96xf32>, vector<8x96xf32> -> vector<8x96xf32>
    %4 = vector.extract_strided_slice %3 {offsets = [0, 0], sizes = [8, 32], strides = [1, 1]} : vector<8x96xf32> to vector<8x32xf32>
    %5 = vector.extract_strided_slice %3 {offsets = [0, 32], sizes = [8, 32], strides = [1, 1]} : vector<8x96xf32> to vector<8x32xf32>
    %6 = vector.extract_strided_slice %3 {offsets = [0, 64], sizes = [8, 32], strides = [1, 1]} : vector<8x96xf32> to vector<8x32xf32>
    %c0_4 = arith.constant 0 : index
    %c0_5 = arith.constant 0 : index
    %7 = vector.load %arg4[%c0_4, %c0_5] : memref<8x32xf32, #tpu.memory_space<vmem>>, vector<8x32xf32>
    %8 = arith.mulf %4, %7 : vector<8x32xf32>
    %c16_i32 = arith.constant 16 : i32
    %9 = tpu.dynamic_rotate %4 by %c16_i32 dim 1 : vector<8x32xf32>, i32 -> vector<8x32xf32>
    %c0_6 = arith.constant 0 : index
    %c0_7 = arith.constant 0 : index
    %10 = vector.load %arg5[%c0_6, %c0_7] : memref<8x32xf32, #tpu.memory_space<vmem>>, vector<8x32xf32>
    %11 = arith.mulf %9, %10 : vector<8x32xf32>
    %12 = arith.addf %8, %11 : vector<8x32xf32>
    %c0_8 = arith.constant 0 : index
    %c0_9 = arith.constant 0 : index
    %13 = vector.load %arg6[%c0_8, %c0_9] : memref<8x32xf32, #tpu.memory_space<vmem>>, vector<8x32xf32>
    %14 = arith.mulf %5, %13 : vector<8x32xf32>
    %c16_i32_10 = arith.constant 16 : i32
    %15 = tpu.dynamic_rotate %5 by %c16_i32_10 dim 1 : vector<8x32xf32>, i32 -> vector<8x32xf32>
    %c0_11 = arith.constant 0 : index
    %c0_12 = arith.constant 0 : index
    %16 = vector.load %arg7[%c0_11, %c0_12] : memref<8x32xf32, #tpu.memory_space<vmem>>, vector<8x32xf32>
    %17 = arith.mulf %15, %16 : vector<8x32xf32>
    %18 = arith.addf %14, %17 : vector<8x32xf32>
    %19 = arith.truncf %12 : vector<8x32xf32> to vector<8x32xbf16>
    %c0_13 = arith.constant 0 : index
    %c0_14 = arith.constant 0 : index
    %c0_15 = arith.constant 0 : index
    %20 = vector.load %arg8[%c0_13, %c0_14, %c0_15] : memref<1x8x32xbf16, #tpu.memory_space<vmem>>, vector<1x8x32xbf16>
    %21 = vector.shape_cast %20 : vector<1x8x32xbf16> to vector<8x32xbf16>
    %22 = vector.shape_cast %19 : vector<8x32xbf16> to vector<1x8x32xbf16>
    tpu.vector_store %arg8[%c0_13, %c0_14, %c0_15], %22 {strides = array<i32>} : memref<1x8x32xbf16, #tpu.memory_space<vmem>>, vector<1x8x32xbf16>,
    %23 = arith.truncf %18 : vector<8x32xf32> to vector<8x32xbf16>
    %c0_16 = arith.constant 0 : index
    %c0_17 = arith.constant 0 : index
    %c0_18 = arith.constant 0 : index
    %24 = vector.load %arg9[%c0_16, %c0_17, %c0_18] : memref<1x8x32xbf16, #tpu.memory_space<vmem>>, vector<1x8x32xbf16>
    %25 = vector.shape_cast %24 : vector<1x8x32xbf16> to vector<8x32xbf16>
    %26 = vector.shape_cast %23 : vector<8x32xbf16> to vector<1x8x32xbf16>
    tpu.vector_store %arg9[%c0_16, %c0_17, %c0_18], %26 {strides = array<i32>} : memref<1x8x32xbf16, #tpu.memory_space<vmem>>, vector<1x8x32xbf16>,
    %27 = arith.truncf %6 : vector<8x32xf32> to vector<8x32xbf16>
    %c0_19 = arith.constant 0 : index
    %c0_20 = arith.constant 0 : index
    %c0_21 = arith.constant 0 : index
    %28 = vector.load %arg10[%c0_19, %c0_20, %c0_21] : memref<1x8x32xbf16, #tpu.memory_space<vmem>>, vector<1x8x32xbf16>
    %29 = vector.shape_cast %28 : vector<1x8x32xbf16> to vector<8x32xbf16>
    %30 = vector.shape_cast %27 : vector<8x32xbf16> to vector<1x8x32xbf16>
    tpu.vector_store %arg10[%c0_19, %c0_20, %c0_21], %30 {strides = array<i32>} : memref<1x8x32xbf16, #tpu.memory_space<vmem>>, vector<1x8x32xbf16>,
    return
  }
  func.func @transform_0(%arg0: i32, %arg1: i32) -> (i32, i32, i32) {
    %c0_i32 = arith.constant 0 : i32
    %c0_i32_0 = arith.constant 0 : i32
    return %arg0, %arg1, %c0_i32 : i32, i32, i32
  }
  func.func @transform_1(%arg0: i32, %arg1: i32) -> (i32, i32) {
    %c0_i32 = arith.constant 0 : i32
    %c0_i32_0 = arith.constant 0 : i32
    %c0_i32_1 = arith.constant 0 : i32
    return %c0_i32, %c0_i32_0 : i32, i32
  }
  func.func @transform_2(%arg0: i32, %arg1: i32) -> (i32, i32) {
    %c0_i32 = arith.constant 0 : i32
    %c0_i32_0 = arith.constant 0 : i32
    return %arg1, %c0_i32 : i32, i32
  }
  func.func @transform_3(%arg0: i32, %arg1: i32) -> (i32, i32) {
    %c0_i32 = arith.constant 0 : i32
    %c0_i32_0 = arith.constant 0 : i32
    return %arg1, %c0_i32 : i32, i32
  }
  func.func @transform_4(%arg0: i32, %arg1: i32) -> (i32, i32) {
    %c0_i32 = arith.constant 0 : i32
    %c0_i32_0 = arith.constant 0 : i32
    return %arg1, %c0_i32 : i32, i32
  }
  func.func @transform_5(%arg0: i32, %arg1: i32) -> (i32, i32) {
    %c0_i32 = arith.constant 0 : i32
    %c0_i32_0 = arith.constant 0 : i32
    return %arg1, %c0_i32 : i32, i32
  }
  func.func @transform_6(%arg0: i32, %arg1: i32) -> (i32, i32, i32) {
    %c0_i32 = arith.constant 0 : i32
    %c0_i32_0 = arith.constant 0 : i32
    return %arg0, %arg1, %c0_i32 : i32, i32, i32
  }
  func.func @transform_7(%arg0: i32, %arg1: i32) -> (i32, i32, i32) {
    %c0_i32 = arith.constant 0 : i32
    %c0_i32_0 = arith.constant 0 : i32
    return %arg0, %arg1, %c0_i32 : i32, i32, i32
  }
  func.func @transform_8(%arg0: i32, %arg1: i32) -> (i32, i32, i32) {
    %c0_i32 = arith.constant 0 : i32
    %c0_i32_0 = arith.constant 0 : i32
    return %arg0, %arg1, %c0_i32 : i32, i32, i32
  }
}

</mosaic_0001>

<bundles_post_ra>
// kernel: tpu_custom_call.1
= control target key start
LH: loop header
LB: loop body
LE: loop exit
PB: predicated region body
PF: predicated region fallthrough
CT: control target
= control target key end

     0   :  { %s1611_s0 = inlined_call_operand.hbm [shape: f32[2,8,32], index: 0, kind: input, shape index: {}]   ;;  %s1612_s1 = inlined_call_operand.hbm [shape: f32[32,96], index: 1, kind: input, shape index: {}]   ;;  %s1613_s2 = inlined_call_operand.hbm [shape: f32[8,32], index: 2, kind: input, shape index: {}]   ;;  %s1614_s3 = inlined_call_operand.hbm [shape: f32[8,32], index: 3, kind: input, shape index: {}]   ;;  %s1615_s4 = inlined_call_operand.hbm [shape: f32[8,32], index: 4, kind: input, shape index: {}]   ;;  %s1616_s5 = inlined_call_operand.hbm [shape: f32[8,32], index: 5, kind: input, shape index: {}]   ;;  %s1617_s6 = inlined_call_operand.hbm [shape: bf16[2,8,32], index: 6, kind: output, shape index: {0}]   ;;  %s1618_s7 = inlined_call_operand.hbm [shape: bf16[2,8,32], index: 7, kind: output, shape index: {1}]   ;;  %s1619_s8 = inlined_call_operand.hbm [shape: bf16[2,8,32], index: 8, kind: output, shape index: {2}]  }
   0x1   :  { %1622 = sst [smem:[#allocation23_spill]] %s1611_s0 }
   0x2   :  { %1623 = sst [smem:[#allocation24_spill]] %s1612_s1 }
   0x3   :  { %1624 = sst [smem:[#allocation25_spill]] %s1613_s2 }
   0x4   :  { %1625 = sst [smem:[#allocation26_spill]] %s1614_s3 }
   0x5   :  { %1626 = sst [smem:[#allocation27_spill]] %s1615_s4 }
   0x6   :  { %1627 = sst [smem:[#allocation28_spill]] %s1616_s5 }
   0x7   :  { %14 = vsyncpa [#allocation3], 0 }
   0x8   :  { %16 = vsyncpa [#allocation3 + $0x1], 0 }
   0x9   :  { %17 = vsyncpa [#allocation6], 0 }
   0xa   :  { %18 = vsyncpa [#allocation9], 0 }
   0xb   :  { %19 = vsyncpa [#allocation12], 0 }
   0xc   :  { %20 = vsyncpa [#allocation4], 0 }
   0xd   :  { %22 = vsyncpa [#allocation4 + $0x1], 0 }
   0xe   :  { %23 = vsyncpa [#allocation15], 0 }
   0xf   :  { %25 = vsyncpa [#allocation15 + $0x1], 0  ;;  %s1367_s27 = smov 0   ;;  %s1369_s28 = smov 0  }
  0x10   :  { %s1371_s29 = smov 0   ;;  %s1373_s30 = smov 0  }
  0x11   :  { %s1375_s9 = smov 0   ;;  %s1377_s10 = smov 0  }
  0x12 LB: > { %s1398_s11 = sadd.s32 4294967295, %s1308_s10   ;;  %p816_p0 = scmp.ge.s32.totalorder %s1308_s10, 1  ;;  %s1308_s10 = sphi %s1377_s10, %s31_s10   ;;  %s1304_s9 = sphi %s1375_s9, %s1646_s9   ;;  %s1300_s30 = sphi %s1373_s30, %s1645_s30   ;;  %s1296_s29 = sphi %s1371_s29, %s1644_s29   ;;  %s1292_s28 = sphi %s1369_s28, %s1643_s28   ;;  %s1288_s27 = sphi %s1367_s27, %s1642_s27  }
  0x13   : > { %p66_p1 = scmp.eq.s32.totalorder %s1398_s11, 0  ;;  %p285_p2 = scmp.lt.s32.totalorder %s1308_s10, 3 }
  0x14   : > { %s1628_s1 = sld [smem:[#allocation24_spill]]  ;;  %s1310_s16 = smov [#allocation5]  }
  0x15   : > { %p1406_p3 = pnand %p816_p0, %p285_p2  ;;  %s298_s17 = sshll.u32 %s1310_s16, 4  ;;  %s299_s17 = int_to_ptr.vmem [resolvable:$true] %s298_s17 }
  0x16   : > { %p822_p6 = scmp.ge.s32.totalorder %s1308_s10, 2  ;;  %s1631_s3 = sld [smem:[#allocation26_spill]] }
  0x17   : > { %p872_p4 = pneg %p1406_p3  ;;  %s1311_s22 = smov 128  }
  0x18   : > { %s1312_s23 = smov 8   ;;  %s1313_s24 = smov [#allocation8]  }
  0x19   : > { %p1414_p5 = pnand %p872_p4, %p66_p1  ;;  %s329_s25 = sshll.u32 %s1313_s24, 4  ;;  %s330_s25 = int_to_ptr.vmem [resolvable:$true] %s329_s25 }
  0x1a   : > { %s296_s14 = sshll.u32 %s1628_s1, 4  ;;  %s1632_s2 = sld [smem:[#allocation25_spill]]  ;;  %s297_s14 = int_to_ptr.hbm [resolvable:$true] %s296_s14 }
  0x1b   : > { %875 = dma.hbm_to_vmem [thread:$0]  (!%p1414_p5), %s297_s14, 512, %s299_s17, [#allocation6], %s1311_s22, %s1311_s22, %s1312_s23  }
  0x1c   : > { %s327_s21 = sshll.u32 %s1631_s3, 4  ;;  %s1633_s4 = sld [smem:[#allocation27_spill]]  ;;  %s328_s21 = int_to_ptr.hbm [resolvable:$true] %s327_s21 }
  0x1d   : > { %881 = dma.hbm_to_vmem [thread:$0]  (!%p1414_p5), %s328_s21, 128, %s330_s25, [#allocation9]  }
  0x1e   : > { %s1314_s1 = smov [#allocation7]   ;;  %s1315_s17 = smov [#allocation10]  }
  0x1f   : > { %s315_s14 = sshll.u32 %s1314_s1, 4  ;;  %s343_s21 = sshll.u32 %s1315_s17, 4  ;;  %s316_s14 = int_to_ptr.vmem [resolvable:$true] %s315_s14  ;;  %s344_s21 = int_to_ptr.vmem [resolvable:$true] %s343_s21 }
  0x20   : > { %s313_s13 = sshll.u32 %s1632_s2, 4  ;;  %s1634_s5 = sld [smem:[#allocation28_spill]]  ;;  %s314_s13 = int_to_ptr.hbm [resolvable:$true] %s313_s13 }
  0x21   : > { %878 = dma.hbm_to_vmem [thread:$0]  (!%p1414_p5), %s314_s13, 128, %s316_s14, [#allocation6]  }
  0x22   : > { %s341_s20 = sshll.u32 %s1633_s4, 4  ;;  %s1316_s1 = smov [#allocation11]   ;;  %s342_s20 = int_to_ptr.hbm [resolvable:$true] %s341_s20 }
  0x23   : > { %884 = dma.hbm_to_vmem [thread:$0]  (!%p1414_p5), %s342_s20, 128, %s344_s21, [#allocation9]  }
  0x24   : > { %s357_s25 = sshll.u32 %s1316_s1, 4  ;;  %s1620_s26 = sadd.s32 4294967294, %s1308_s10   ;;  %s358_s25 = int_to_ptr.vmem [resolvable:$true] %s357_s25 }
  0x25   : > { %s43_s12 = sadd.s32 1, %s1304_s9  ;;  %s52_s13 = sadd.s32 1, %s1296_s29 }
  0x26   : > { %s355_s24 = sshll.u32 %s1634_s5, 4  ;;  %p45_p7 = scmp.ge.s32.totalorder %s43_s12, 2  ;;  %s356_s24 = int_to_ptr.hbm [resolvable:$true] %s355_s24 }
  0x27   : > { %887 = dma.hbm_to_vmem [thread:$0]  (!%p1414_p5), %s356_s24, 128, %s358_s25, [#allocation12]  }
  0x28   : > { %p59_p8 = scmp.ne.s32.totalorder %s1296_s29, %s1292_s28  ;;  %p60_p9 = scmp.eq.s32.totalorder %s1308_s10, 0 }
  0x29   : > { %p65_p10 = scmp.ne.s32.totalorder %s1292_s28, %s1288_s27  ;;  %s1648_s12 = smov (%p45_p7, %s43_s12), 0 }
  0x2a   : > { %p1451_p11 = por %p60_p9, %p59_p8  ;;  %s47_s19 = ssub.s32 %s1304_s9, %s1648_s12 }
  0x2b   : > { %p1457_p12 = por %p66_p1, %p65_p10  ;;  %p216_p13 = scmp.eq.s32.totalorder %s1398_s11, 1 }
  0x2c   : > { %p50_p0 = scmp.eq.s32.totalorder %s47_s19, 0  ;;  %p222_p2 = scmp.eq.s32.totalorder %s1620_s26, 1 }
  0x2d   : > { %p1466_p4 = por %p216_p13, %p59_p8  ;;  %p907_p5 = scmp.lt.s32.totalorder %s1308_s10, 2 }
  0x2e   : > { %s1472_s14 = scalar_select %p50_p0, %s1296_s29, %s52_s13  }
  0x2f   : > { %p1474_p7 = por %p222_p2, %p65_p10  ;;  %s368_s21 = sand.u32 1, %s1296_s29  }
  0x30   : > { %s823_s22 = sshll.u32 %s368_s21, 3  ;;  %s824_s23 = sshll.u32 %s1304_s9, 3 }
  0x31   : > { %s1639_s0 = sld [smem:[#allocation23_spill]]  ;;  %s372_s19 = scalar_lea.vmem [#allocation2], %s823_s22 }
  0x32   : > { %s381_s26 = sshll.u32 %s372_s19, 4  ;;  %p889_p8 = pnand %p907_p5, %p1451_p11  ;;  %s382_s26 = int_to_ptr.vmem [resolvable:$true] %s381_s26 }
  0x33   : > { %s369_s13 = scalar_lea.sflag [#allocation3], %s368_s21  ;;  %s1488_s3 = sand.u32 (!%p1406_p3), 1, %s1292_s28  }
  0x34   : > { %s826_s24 = sshll.u32 (!%p1406_p3), %s1488_s3, 3 }
  0x35   : > { %390 = sbr.rel (%p1406_p3) target bundleno = 773 (0x305), region = 44  ;;  %s396_s22 = scalar_lea.vmem (!%p1406_p3), [#allocation2], %s826_s24 }
  0x37   : > { %s377_s25 = scalar_lea.hbm %s1639_s0, %s824_s23  ;;  %s393_s23 = scalar_lea.sflag (!%p1406_p3), [#allocation3], %s1488_s3 }
  0x38   : > { %s379_s2 = sshll.u32 %s377_s25, 4  ;;  %s380_s2 = int_to_ptr.hbm [resolvable:$true] %s379_s2 }
  0x39   : > { %891 = dma.hbm_to_vmem [thread:$0]  (!%p889_p8), %s380_s2, 128, %s382_s26, %s369_s13  }
  0x3a   : > { %1263 = dma.done.wait (%p1457_p12), %s393_s23, 128  }
  0x3b   : > { %1265 = vsyncadd (%p1457_p12), %s393_s23, 4294967168 }
  0x3c   : > { %1267 = dma.done.wait (%p66_p1), [#allocation6], 640  }
  0x3d   : > { %1269 = vsyncadd (%p66_p1), [#allocation6], 4294966656 }
  0x3e   : > { %1271 = dma.done.wait (%p66_p1), [#allocation9], 256  }
  0x3f   : > { %1273 = vsyncadd (%p66_p1), [#allocation9], 4294967040 }
  0x40   : > { %1275 = dma.done.wait (%p66_p1), [#allocation12], 128  }
  0x41   : > { %1277 = vsyncadd (%p66_p1), [#allocation12], 4294967168  ;;  %v469_v0 = vld [vmem:[#allocation5 + $0x18] sm:$0xff]  ;;  %v468_v1 = vld [vmem:[#allocation5 + $0x10] sm:$0xff]  ;;  %vm470_vm0 = vcmask 261120   ;;  %s1317_s2 = smov 16  }
  0x42   : > { %486 = vmatpush.msra.mxu0 %v469_v0  ;;  %v467_v2 = vld [vmem:[#allocation5 + $0x8] sm:$0xff]  ;;  %v466_v3 = vld [vmem:[#allocation5] sm:$0xff]  ;;  %v465_v4 = vld [vmem:[%s396_s22] sm:$0xff]  ;;  %s1318_s15 = smov 32   ;;  %s1319_s26 = smov 96   ;;  %vm496_vm1 = vcmask 1047808  }
  0x43   : > { %v530_v5 = vld [vmem:[#allocation11] sm:$0xff]  ;;  %v514_v10 = vld [vmem:[#allocation10] sm:$0xff]  ;;  %v503_v13 = vld [vmem:[#allocation8] sm:$0xff]  ;;  %s1320_s16 = smov 112   ;;  %s1321_s18 = smov 64   ;;  %vm542_vm2 = vcmask 257024  }
  0x44   : > { %487 = vmatpush.msra.mxu0 %v468_v1  ;;  %532 = vrot.lane.b32.xlu2 %v530_v5, %s1317_s2  ;;  %s1514_s21 = sshll.u32 %s1488_s3, 2  ;;  %s1522_s25 = sshll.u32 %s1300_s30, 2  ;;  %v494_v29 = vld [vmem:[#allocation7] sm:$0xff] }
  0x45   : > { %s1621_s1 = scalar_lea.vmem [#allocation16], %s1514_s21  ;;  %s578_s24 = scalar_lea.hbm %s1617_s6, %s1522_s25 }
  0x46   : > { %488 = vmatpush.msra.mxu0 %v467_v2  ;;  %s450_s23 = scalar_lea.vmem [#allocation13], %s1514_s21  ;;  %s557_s30 = scalar_lea.sflag [#allocation4], %s1488_s3 }
  0x47   : > { %s580_s22 = sshll.u32 %s450_s23, 4  ;;  %s1174_s19 = scalar_lea.hbm %s1617_s6, 8  ;;  %s581_s22 = int_to_ptr.vmem [resolvable:$true] %s580_s22 }
  0x48   : > { %489 = vmatpush.msra.mxu0 %v466_v3 }
  0x49   : > { %835 = vmatmul.msk.f32.vlgmr.msra.gmra.mxu0 %vm470_vm0, %v465_v4 }
  0x9e   : > { %v533_v14 = vpop.permute.xlu2 %532 }
  0xc6   : > { %v491_v6 = vpop.f32.mrf.mxu0 }
  0xc7   : > { %497 = vrot.lane.b32.xlu1 %v491_v6, %s1318_s15  ;;  %521 = vrot.lane.b32.xlu0 %v491_v6, %s1319_s26  ;;  %v550_v22 = vpack.c.bf16 %v491_v6, %v491_v6  ;;  %v495_v30 = vmul.f32 %v494_v29, %v491_v6 }
 0x139   : > { %v498_v7 = vpop.permute.xlu1 %497  ;;  %v522_v8 = vpop.permute.xlu0 %521 }
 0x13a   : > { %524 = vrot.lane.b32.xlu0 %v522_v8, %s1318_s15  ;;  %v499_v9 = vsel %vm496_vm1, %v498_v7, %v491_v6 }
 0x13b   : > { %500 = vrot.lane.b32.xlu2 %v499_v9, %s1318_s15 }
 0x142   : > { %516 = vrot.lane.b32.xlu0 %v514_v10, %s1318_s15 }
 0x195   : > { %v501_v18 = vpop.permute.xlu2 %500 }
 0x196   : > { %v502_v19 = vsel %vm496_vm1, %v501_v18, %v491_v6 }
 0x1ac   : > { %v525_v11 = vpop.permute.xlu0 %524 }
 0x1ad   : > { %v526_v12 = vsel %vm496_vm1, %v525_v11, %v522_v8 }
 0x1ae   : > { %527 = vrot.lane.b32.xlu1 %v526_v12, %s1318_s15 }
 0x1b4   : > { %v517_v23 = vpop.permute.xlu0 %516 }
 0x1b5   : > { %v519_v24 = vmul.f32 %v517_v23, %v491_v6 }
 0x1b6   : > { %505 = vrot.lane.b32.xlu1 %v503_v13, %s1317_s2 }
 0x220   : > { %v528_v15 = vpop.permute.xlu1 %527 }
 0x221   : > { %v529_v16 = vsel %vm496_vm1, %v528_v15, %v522_v8 }
 0x222   : > { %v535_v17 = vmul.f32 %v533_v14, %v529_v16 }
 0x224   : > { %537 = vrot.lane.b32.xlu2 %v535_v17, %s1317_s2  ;;  %s582_s2 = sshll.u32 %s578_s24, 4  ;;  %s583_s2 = int_to_ptr.hbm [resolvable:$true] %s582_s2 }
 0x225   : > { %s1168_s15 = sshra.s32 %s583_s2, 4  ;;  %s1169_s15 = int_to_ptr.hbm [resolvable:$true] %s1168_s15 }
 0x226   : > { %p1175_p10 = scmp.lt.s32.totalorder %s1169_s15, %s1617_s6 }
 0x228   : > { %v506_v20 = vpop.permute.xlu1 %505 }
 0x229   : > { %v508_v21 = vmul.f32 %v506_v20, %v502_v19 }
 0x22b   : > { %510 = vrot.lane.b32.xlu0 %v508_v21, %s1320_s16 }
 0x22c   : > { %552 = vrot.lane.b32.xlu2 %v550_v22, %s1321_s18 }
 0x27e   : > { %v538_v25 = vpop.permute.xlu2 %537 }
 0x27f   : > { %v540_v26 = vadd.f32 %v538_v25, %v519_v24 }
 0x281   : > { %v544_v27 = vpack.c.bf16 %v540_v26, %v540_v26 }
 0x283   : > { %546 = vrot.lane.b32.xlu1 %v544_v27, %s1319_s26  ;;  %s1170_s26 = scalar_lea.hbm %s1169_s15, 4 }
 0x284   : > { %p1171_p1 = scmp.ne.s32.totalorder %s1169_s15, %s1170_s26  ;;  %p1176_p11 = scmp.lt.s32.totalorder %s1174_s19, %s1170_s26 }
 0x286   : > { %v553_v28 = vpop.permute.xlu2 %552  ;;  %p1172_p3 = pnand %p1171_p1, %p1466_p4  ;;  %p1177_p12 = por %p1176_p11, %p1175_p10 }
 0x287   : > { %555 = vst.msk [vmem:[%s1621_s1] sm:$0xf] %vm542_vm2, %v553_v28 }
 0x288   : > { %p1173_p9 = pneg %p1172_p3 }
 0x28a   : > { %p1178_p13 = pnand %p1177_p12, %p1173_p9 }
 0x29d   : > { %v511_v31 = vpop.permute.xlu0 %510 }
 0x29e   : > { %v513_v32 = vadd.f32 %v511_v31, %v495_v30 }
 0x2a0   : > { %v541_v33 = vpack.c.bf16 %v513_v32, %v513_v32 }
 0x2a2   : > { %543 = vst.msk [vmem:[%s450_s23] sm:$0xf] %vm542_vm2, %v541_v33 }
 0x2a3   : > { %1181 = shalt.err (!%p1178_p13)
}
 0x2a4   : > { %866 = dma.vmem_to_hbm [thread:$0]  (%p1466_p4), %s581_s22, 64, %s583_s2, %s557_s30  }
 0x2a5   : > { %s593_s16 = scalar_lea.hbm %s1618_s7, %s1522_s25  ;;  %s608_s15 = scalar_lea.hbm %s1619_s8, %s1522_s25 }
 0x2a6   : > { %s561_s26 = sand.u32 1, %s1398_s11   ;;  %s457_s19 = scalar_lea.vmem [#allocation14], %s1514_s21 }
 0x2a7   : > { %s595_s13 = sshll.u32 %s457_s19, 4  ;;  %s597_s24 = sshll.u32 %s593_s16, 4  ;;  %s596_s13 = int_to_ptr.vmem [resolvable:$true] %s595_s13  ;;  %s598_s24 = int_to_ptr.hbm [resolvable:$true] %s597_s24 }
 0x2a8   : > { %s1640_s0 = scalar_lea.vmem [#allocation16], %s1514_s21  ;;  %s1555_s5 = sshll.u32 %s608_s15, 4  ;;  %s613_s5 = int_to_ptr.hbm [resolvable:$true] %s1555_s5 }
 0x2a9   : > { %s1553_s4 = sshll.u32 %s1640_s0, 4  ;;  %s562_s1 = scalar_lea.sflag [#allocation15], %s561_s26  ;;  %s611_s4 = int_to_ptr.vmem [resolvable:$true] %s1553_s4 }
 0x2aa   : > { %s1196_s11 = sshra.s32 %s598_s24, 4  ;;  %s1202_s22 = scalar_lea.hbm %s1618_s7, 8  ;;  %s1197_s11 = int_to_ptr.hbm [resolvable:$true] %s1196_s11 }
 0x2ab   : > { %s1198_s25 = scalar_lea.hbm %s1197_s11, 4  ;;  %p1203_p8 = scmp.lt.s32.totalorder %s1197_s11, %s1618_s7 }
 0x2ac   : > { %p1199_p0 = scmp.ne.s32.totalorder %s1197_s11, %s1198_s25  ;;  %p1204_p1 = scmp.lt.s32.totalorder %s1202_s22, %s1198_s25 }
 0x2ae   : > { %p1200_p2 = pnand %p1199_p0, %p1466_p4  ;;  %p1205_p3 = por %p1204_p1, %p1203_p8 }
 0x2b0   : > { %p1201_p5 = pneg %p1200_p2 }
 0x2b2   : > { %p1206_p9 = pnand %p1205_p3, %p1201_p5 }
 0x2f5   : > { %v547_v34 = vpop.permute.xlu1 %546 }
 0x2f6   : > { %549 = vst.msk [vmem:[%s457_s19] sm:$0xf] %vm542_vm2, %v547_v34 }
 0x2f7   : > { %1209 = shalt.err (!%p1206_p9)
}
 0x2f8   : > { %867 = dma.vmem_to_hbm [thread:$0]  (%p1466_p4), %s596_s13, 64, %s598_s24, %s562_s1  }
 0x2f9   : > { %s1224_s3 = sshra.s32 %s613_s5, 4  ;;  %s1230_s15 = scalar_lea.hbm %s1619_s8, 8  ;;  %s1225_s3 = int_to_ptr.hbm [resolvable:$true] %s1224_s3 }
 0x2fa   : > { %s1226_s23 = scalar_lea.hbm %s1225_s3, 4  ;;  %p1231_p13 = scmp.lt.s32.totalorder %s1225_s3, %s1619_s8 }
 0x2fb   : > { %p1227_p10 = scmp.ne.s32.totalorder %s1225_s3, %s1226_s23  ;;  %p1232_p0 = scmp.lt.s32.totalorder %s1230_s15, %s1226_s23 }
 0x2fd   : > { %p1228_p11 = pnand %p1227_p10, %p1466_p4  ;;  %p1233_p2 = por %p1232_p0, %p1231_p13 }
 0x2ff   : > { %p1229_p12 = pneg %p1228_p11 }
 0x301   : > { %p1234_p5 = pnand %p1233_p2, %p1229_p12 }
 0x303   : > { %1237 = shalt.err (!%p1234_p5)
}
 0x304   : > { %868 = dma.vmem_to_hbm [thread:$0]  (%p1466_p4), %s611_s4, 64, %s613_s5, %s562_s1  }
 0x305 PF: > { %s624_s13 = sand.u32 1, %s1288_s27   ;;  %p893_p8 = pnand %p822_p6, %p1474_p7 }
 0x306   : > { %s625_s24 = scalar_lea.sflag [#allocation4], %s624_s13 }
 0x307   : > { %p894_p1 = pneg %p893_p8 }
 0x309   : > { %1279 = dma.done.wait (%p894_p1), %s625_s24, 64  }
 0x30a   : > { %1281 = vsyncadd (%p894_p1), %s625_s24, 4294967232  ;;  %s1641_s11 = sadd.s32 4294967294, %s1308_s10  }
 0x30b   : > { %s634_s20 = sand.u32 1, %s1641_s11  }
 0x30c   : > { %s635_s25 = scalar_lea.sflag [#allocation15], %s634_s20 }
 0x30d   : > { %1283 = dma.done.wait (%p894_p1), %s635_s25, 128  }
 0x30e   : > { %1285 = vsyncadd (%p894_p1), %s635_s25, 4294967168  ;;  %s31_s10 = sadd.s32 1, %s1308_s10   ;;  %s1642_s27 = smov %s1292_s28 }
 0x30f   : > { %p28_p4 = scmp.ge.s32.totalorder %s31_s10, 4   ;;  %s1643_s28 = smov %s1296_s29 }
 0x310   : > { %s1644_s29 = smov %s1472_s14  ;;  %s1645_s30 = smov %s1304_s9 }
 0x311   : > { %s1646_s9 = smov %s1648_s12  ;;  %30 = sbr.rel (!%p28_p4) target bundleno = 18 (0x12), region = 145 }
 0x316   :  { %651 = vsyncpa [#allocation3], 1 }
 0x317   :  { %653 = vsyncpa [#allocation3 + $0x1], 1 }
 0x318   :  { %654 = vsyncpa [#allocation6], 1 }
 0x319   :  { %655 = vsyncpa [#allocation9], 1 }
 0x31a   :  { %656 = vsyncpa [#allocation12], 1 }
 0x31b   :  { %657 = vsyncpa [#allocation4], 1 }
 0x31c   :  { %659 = vsyncpa [#allocation4 + $0x1], 1 }
 0x31d   :  { %660 = vsyncpa [#allocation15], 1 }
 0x31e   :  { %662 = vsyncpa [#allocation15 + $0x1], 1 }

</bundles_post_ra>
